<compile_context>
chip_gen: v6e
topology: v6e:2x2x1
jax: 0.10.0
libtpu: 0.0.40
codegen_flags: <defaults>
</compile_context>

<pallas_src>
import functools

import jax
import jax.numpy as jnp
from jax.experimental import pallas as pl
from jax.experimental.pallas import tpu as pltpu


def _round_up(x, m):
    return (x + m - 1) // m * m


# ----------------------------------------------------------------------------
# Fused kernel: grid = (num_layers, num_row_blocks)
#   i == 0        : T = H_prev @ W_l        (H_prev = X for layer 0)
#   every i       : Z_i = A_hat[i*tm:(i+1)*tm, :] @ T + b_l
#   l <  last     : H[i*tm:(i+1)*tm, :] = relu(Z_i)   (bf16, stays in VMEM)
#   l == last     : output block = Z_i (f32, no ReLU)
# ----------------------------------------------------------------------------
def _fused_encoder_kernel(a_ref, x_ref, w_ref, b_ref, o_ref, h_ref, t_ref, *, tm):
    l = pl.program_id(0)
    i = pl.program_id(1)
    last_layer = pl.num_programs(0) - 1

    # ---- Phase 1 (once per layer): feature transform T = H_prev @ W_l ----
    @pl.when(i == 0)
    def _compute_t():
        @pl.when(l == 0)
        def _():
            t = jnp.dot(x_ref[...], w_ref[0],
                        preferred_element_type=jnp.float32)
            t_ref[...] = t.astype(t_ref.dtype)

        @pl.when(l > 0)
        def _():
            t = jnp.dot(h_ref[...], w_ref[0],
                        preferred_element_type=jnp.float32)
            t_ref[...] = t.astype(t_ref.dtype)

    # ---- Phase 2 (every row block): aggregate, then bias (GCNConv order) ----
    z = jnp.dot(a_ref[...], t_ref[...], preferred_element_type=jnp.float32)
    z = z + b_ref[0]

    # Final-layer result (no ReLU). Writes on earlier layers are harmlessly
    # overwritten when the block index is revisited at the last layer.
    o_ref[...] = z.astype(o_ref.dtype)

    # Hidden state for the next layer: ReLU (+ eval-mode dropout = identity).
    @pl.when(l < last_layer)
    def _store_hidden():
        row = pl.multiple_of(i * tm, tm)
        h_ref[pl.ds(row, tm), :] = jnp.maximum(z, 0.0).astype(h_ref.dtype)


# ----------------------------------------------------------------------------
# Glue: normalized adjacency  D^{-1/2}(A+I)D^{-1/2}  from edge_index
# (no edge de-duplication, matching GCNConv's sum-over-edges semantics)
# ----------------------------------------------------------------------------
def build_norm_adj(edge_index, num_nodes):
    src, dst = edge_index[0], edge_index[1]
    adj = jnp.zeros((num_nodes, num_nodes), dtype=jnp.float32)
    # message flows src -> dst : row = dst (receiver), col = src (sender)
    adj = adj.at[dst, src].add(1.0)
    adj = adj + jnp.eye(num_nodes, dtype=jnp.float32)  # self-loops
    deg = adj.sum(axis=1)
    d_inv_sqrt = jnp.where(deg > 0, jax.lax.rsqrt(deg), 0.0)
    return adj * d_inv_sqrt[:, None] * d_inv_sqrt[None, :]


# ----------------------------------------------------------------------------
# Encoder forward: conv1 -> relu -> dropout(eval) -> conv2 -> relu -> conv3
# ----------------------------------------------------------------------------
def encoder_forward(params, x, edge_index, *, tm=128, lane=128):
    n, in_ch = x.shape
    hidden = params["w1"].shape[1]
    n_layers = 3

    f_pad = _round_up(max(in_ch, hidden), lane)   # lane-dense feature dim
    n_pad = _round_up(n, tm)                      # node dim padded to row tile
    nrb = n_pad // tm

    # Normalized adjacency, zero-padded, bf16 (halves HBM traffic on the
    # dominant operand; MXU accumulates in f32).
    a_hat = build_norm_adj(edge_index, n)
    a_hat = jnp.pad(a_hat, ((0, n_pad - n), (0, n_pad - n))).astype(jnp.bfloat16)

    x_p = jnp.pad(x, ((0, n_pad - n), (0, f_pad - in_ch))).astype(jnp.bfloat16)

    def pad_w(w):
        return jnp.pad(w, ((0, f_pad - w.shape[0]), (0, f_pad - w.shape[1])))

    def pad_b(b):
        return jnp.pad(b, ((0, 0), (0, f_pad - b.shape[1])))

    w_stack = jnp.stack(
        [pad_w(params["w1"]), pad_w(params["w2"]), pad_w(params["w3"])]
    ).astype(jnp.bfloat16)                                  # [3, f_pad, f_pad]
    b_stack = jnp.stack(
        [pad_b(params["b1"]), pad_b(params["b2"]), pad_b(params["b3"])]
    ).astype(jnp.float32)                                   # [3, 1, f_pad]

    # Advisory cost estimate for the XLA scheduler.
    flops = n_layers * (2 * n_pad * f_pad * f_pad + 2 * n_pad * n_pad * f_pad)
    bytes_accessed = (n_layers * n_pad * n_pad * 2        # A_hat rows (per layer)
                      + n_pad * f_pad * 2                  # X
                      + n_layers * f_pad * f_pad * 2       # W
                      + n_layers * f_pad * 4               # b
                      + n_pad * f_pad * 4)                 # output

    # VMEM budget (sized so the plan also fits v7x's 64 MiB VMEM).
    vmem_bytes = (2 * tm * n_pad * 2        # A_hat row block, double-buffered
                  + n_pad * f_pad * 2       # X resident
                  + 2 * f_pad * f_pad * 2   # W double-buffered
                  + 2 * f_pad * 4           # bias
                  + 2 * tm * f_pad * 4      # output block double-buffered
                  + 2 * n_pad * f_pad * 2)  # H + T scratch
    vmem_limit = min(max(int(vmem_bytes * 1.5) + (1 << 20), 4 << 20), 64 << 20)

    kernel = functools.partial(_fused_encoder_kernel, tm=tm)
    out = pl.pallas_call(
        kernel,
        out_shape=jax.ShapeDtypeStruct((n_pad, f_pad), jnp.float32),
        grid_spec=pltpu.PrefetchScalarGridSpec(
            num_scalar_prefetch=0,
            grid=(n_layers, nrb),
            in_specs=[
                pl.BlockSpec((tm, n_pad), lambda l, i: (i, 0)),          # A_hat rows
                pl.BlockSpec((n_pad, f_pad), lambda l, i: (0, 0)),       # X (resident)
                pl.BlockSpec((1, f_pad, f_pad), lambda l, i: (l, 0, 0)), # W_l
                pl.BlockSpec((1, 1, f_pad), lambda l, i: (l, 0, 0)),     # b_l
            ],
            out_specs=pl.BlockSpec((tm, f_pad), lambda l, i: (i, 0)),
            scratch_shapes=[
                pltpu.VMEM((n_pad, f_pad), jnp.bfloat16),   # H (hidden state)
                pltpu.VMEM((n_pad, f_pad), jnp.bfloat16),   # T = H @ W
            ],
        ),
        compiler_params=pltpu.CompilerParams(
            # Layer axis is a true dependency chain; row blocks within a layer
            # all read the shared T scratch written at i == 0, so both axes
            # must be sequential on one core.
            dimension_semantics=("arbitrary", "arbitrary"),
            vmem_limit_bytes=vmem_limit,
        ),
        cost_estimate=pl.CostEstimate(
            flops=flops, transcendentals=0, bytes_accessed=bytes_accessed),
    )(a_hat, x_p, w_stack, b_stack)

    return out[:n, :hidden]


def init_params(key, in_channels, hidden_channels):
    def glorot(k, fan_in, fan_out):
        limit = jnp.sqrt(6.0 / (fan_in + fan_out))
        return jax.random.uniform(k, (fan_in, fan_out), jnp.float32, -limit, limit)

    k1, k2, k3, kb1, kb2, kb3 = jax.random.split(key, 6)
    # Non-zero biases so the bias-after-aggregation ordering is actually tested.
    return {
        "w1": glorot(k1, in_channels, hidden_channels),
        "b1": 0.1 * jax.random.normal(kb1, (1, hidden_channels), jnp.float32),
        "w2": glorot(k2, hidden_channels, hidden_channels),
        "b2": 0.1 * jax.random.normal(kb2, (1, hidden_channels), jnp.float32),
        "w3": glorot(k3, hidden_channels, hidden_channels),
        "b3": 0.1 * jax.random.normal(kb3, (1, hidden_channels), jnp.float32),
    }


if __name__ == "__main__":
    key = jax.random.PRNGKey(0)
    k_x, k_e, k_p = jax.random.split(key, 3)

    num_nodes = 16
    in_channels = 8
    hidden_channels = 32
    num_edges = 40

    x = jax.random.normal(k_x, (num_nodes, in_channels), dtype=jnp.float32)
    edge_index = jax.random.randint(k_e, (2, num_edges), 0, num_nodes, dtype=jnp.int32)
    params = init_params(k_p, in_channels, hidden_channels)

    out = jax.jit(encoder_forward)(params, x, edge_index)
    out = jax.block_until_ready(out)
    assert out.shape == (num_nodes, hidden_channels)

    # Reference in plain JAX with matching precision (bf16 operands, f32 accum,
    # bias added after aggregation — GCNConv order).
    a_bf = build_norm_adj(edge_index, num_nodes).astype(jnp.bfloat16)

    def ref_layer(h_bf, w, b, relu):
        t = jnp.dot(h_bf, w.astype(jnp.bfloat16),
                    preferred_element_type=jnp.float32).astype(jnp.bfloat16)
        z = jnp.dot(a_bf, t, preferred_element_type=jnp.float32) + b
        return jnp.maximum(z, 0.0) if relu else z

    h1 = ref_layer(x.astype(jnp.bfloat16), params["w1"], params["b1"], True)
    h2 = ref_layer(h1.astype(jnp.bfloat16), params["w2"], params["b2"], True)
    ref = ref_layer(h2.astype(jnp.bfloat16), params["w3"], params["b3"], False)

    max_err = float(jnp.max(jnp.abs(out - ref)))
    assert jnp.allclose(out, ref, atol=1e-2, rtol=1e-2), max_err

    print("KERNEL_OK")
</pallas_src>

<mosaic_0001>
module attributes {stable_mosaic.version = 11 : i64} {
  func.func private @main(%arg0: i32) attributes {dimension_semantics = [#tpu.dimension_semantics<core_parallel>], iteration_bounds = array<i64: 2>, tpu.core_type = #tpu.core_type<sc_scalar_subcore>, window_params = []} {
    return
  }
}

module attributes {stable_mosaic.version = 11 : i64} {
  func.func private @main(%arg0: i32) attributes {dimension_semantics = [#tpu.dimension_semantics<core_parallel>], iteration_bounds = array<i64: 2>, tpu.core_type = #tpu.core_type<sc_scalar_subcore>, window_params = []} {
    return
  }
}

module attributes {stable_mosaic.version = 11 : i64} {
  func.func @_fused_encoder_kernel(%arg0: i32, %arg1: i32, %arg2: memref<128x128xbf16, #tpu.memory_space<vmem>>, %arg3: memref<128x128xbf16, #tpu.memory_space<vmem>>, %arg4: memref<1x128x128xbf16, #tpu.memory_space<vmem>>, %arg5: memref<1x1x128xf32, #tpu.memory_space<vmem>>, %arg6: memref<128x128xf32, #tpu.memory_space<vmem>>, %arg7: memref<128x128xbf16, #tpu.memory_space<vmem>>, %arg8: memref<128x128xbf16, #tpu.memory_space<vmem>>) attributes {dimension_semantics = [#tpu.dimension_semantics<arbitrary>, #tpu.dimension_semantics<arbitrary>], iteration_bounds = array<i64: 3, 1>, scalar_prefetch = 0 : i64, scratch_operands = 2 : i64, tpu.core_type = #tpu.core_type<tc>, window_params = [{transform_indices = @transform_0, window_bounds = array<i64: 128, 128>}, {pipeline_mode = #tpu.pipeline_mode<synchronous>, transform_indices = @transform_1, window_bounds = array<i64: 128, 128>}, {transform_indices = @transform_2, window_bounds = array<i64: 1, 128, 128>}, {transform_indices = @transform_3, window_bounds = array<i64: 1, 1, 128>}, {transform_indices = @transform_4, window_bounds = array<i64: 128, 128>}]} {
    %c0_i32 = arith.constant 0 : i32
    %0 = arith.cmpi eq, %arg1, %c0_i32 : i32
    %1 = arith.extui %0 : i1 to i32
    %c0_i32_0 = arith.constant 0 : i32
    %2 = arith.cmpi ne, %1, %c0_i32_0 : i32
    scf.if %2 {
      %c0_i32_10 = arith.constant 0 : i32
      %14 = arith.cmpi eq, %arg0, %c0_i32_10 : i32
      %15 = arith.extui %14 : i1 to i32
      %c0_i32_11 = arith.constant 0 : i32
      %16 = arith.cmpi ne, %15, %c0_i32_11 : i32
      scf.if %16 {
        %c0_14 = arith.constant 0 : index
        %c0_15 = arith.constant 0 : index
        %20 = vector.load %arg3[%c0_14, %c0_15] : memref<128x128xbf16, #tpu.memory_space<vmem>>, vector<128x128xbf16>
        %c0_16 = arith.constant 0 : index
        %c0_17 = arith.constant 0 : index
        %c0_18 = arith.constant 0 : index
        %21 = vector.load %arg4[%c0_16, %c0_17, %c0_18] : memref<1x128x128xbf16, #tpu.memory_space<vmem>>, vector<1x128x128xbf16>
        %22 = vector.shape_cast %21 : vector<1x128x128xbf16> to vector<128x128xbf16>
        %cst_19 = arith.constant dense<0.000000e+00> : vector<128x128xf32>
        %23 = tpu.matmul %20, %22, %cst_19 {dimension_numbers = #tpu.dot_dimension_numbers<[1], [0], [0], [1], [0, 0, 1, 1], [], []>} : vector<128x128xbf16>, vector<128x128xbf16>, vector<128x128xf32> -> vector<128x128xf32>
        %24 = arith.truncf %23 : vector<128x128xf32> to vector<128x128xbf16>
        %c0_20 = arith.constant 0 : index
        %c0_21 = arith.constant 0 : index
        %25 = vector.load %arg8[%c0_20, %c0_21] : memref<128x128xbf16, #tpu.memory_space<vmem>>, vector<128x128xbf16>
        tpu.vector_store %arg8[%c0_20, %c0_21], %24 {strides = array<i32>} : memref<128x128xbf16, #tpu.memory_space<vmem>>, vector<128x128xbf16>,
      } else {
      }
      %c0_i32_12 = arith.constant 0 : i32
      %17 = arith.cmpi sgt, %arg0, %c0_i32_12 : i32
      %18 = arith.extui %17 : i1 to i32
      %c0_i32_13 = arith.constant 0 : i32
      %19 = arith.cmpi ne, %18, %c0_i32_13 : i32
      scf.if %19 {
        %c0_14 = arith.constant 0 : index
        %c0_15 = arith.constant 0 : index
        %20 = vector.load %arg7[%c0_14, %c0_15] : memref<128x128xbf16, #tpu.memory_space<vmem>>, vector<128x128xbf16>
        %c0_16 = arith.constant 0 : index
        %c0_17 = arith.constant 0 : index
        %c0_18 = arith.constant 0 : index
        %21 = vector.load %arg4[%c0_16, %c0_17, %c0_18] : memref<1x128x128xbf16, #tpu.memory_space<vmem>>, vector<1x128x128xbf16>
        %22 = vector.shape_cast %21 : vector<1x128x128xbf16> to vector<128x128xbf16>
        %cst_19 = arith.constant dense<0.000000e+00> : vector<128x128xf32>
        %23 = tpu.matmul %20, %22, %cst_19 {dimension_numbers = #tpu.dot_dimension_numbers<[1], [0], [0], [1], [0, 0, 1, 1], [], []>} : vector<128x128xbf16>, vector<128x128xbf16>, vector<128x128xf32> -> vector<128x128xf32>
        %24 = arith.truncf %23 : vector<128x128xf32> to vector<128x128xbf16>
        %c0_20 = arith.constant 0 : index
        %c0_21 = arith.constant 0 : index
        %25 = vector.load %arg8[%c0_20, %c0_21] : memref<128x128xbf16, #tpu.memory_space<vmem>>, vector<128x128xbf16>
        tpu.vector_store %arg8[%c0_20, %c0_21], %24 {strides = array<i32>} : memref<128x128xbf16, #tpu.memory_space<vmem>>, vector<128x128xbf16>,
      } else {
      }
    } else {
    }
    %c0 = arith.constant 0 : index
    %c0_1 = arith.constant 0 : index
    %3 = vector.load %arg2[%c0, %c0_1] : memref<128x128xbf16, #tpu.memory_space<vmem>>, vector<128x128xbf16>
    %c0_2 = arith.constant 0 : index
    %c0_3 = arith.constant 0 : index
    %4 = vector.load %arg8[%c0_2, %c0_3] : memref<128x128xbf16, #tpu.memory_space<vmem>>, vector<128x128xbf16>
    %cst = arith.constant dense<0.000000e+00> : vector<128x128xf32>
    %5 = tpu.matmul %3, %4, %cst {dimension_numbers = #tpu.dot_dimension_numbers<[1], [0], [0], [1], [0, 0, 1, 1], [], []>} : vector<128x128xbf16>, vector<128x128xbf16>, vector<128x128xf32> -> vector<128x128xf32>
    %c0_4 = arith.constant 0 : index
    %c0_5 = arith.constant 0 : index
    %c0_6 = arith.constant 0 : index
    %6 = vector.load %arg5[%c0_4, %c0_5, %c0_6] : memref<1x1x128xf32, #tpu.memory_space<vmem>>, vector<1x1x128xf32>
    %7 = vector.shape_cast %6 : vector<1x1x128xf32> to vector<1x128xf32>
    %8 = vector.broadcast %7 : vector<1x128xf32> to vector<128x128xf32>
    %9 = arith.addf %5, %8 : vector<128x128xf32>
    %c0_7 = arith.constant 0 : index
    %c0_8 = arith.constant 0 : index
    %10 = vector.load %arg6[%c0_7, %c0_8] : memref<128x128xf32, #tpu.memory_space<vmem>>, vector<128x128xf32>
    tpu.vector_store %arg6[%c0_7, %c0_8], %9 {strides = array<i32>} : memref<128x128xf32, #tpu.memory_space<vmem>>, vector<128x128xf32>,
    %c2_i32 = arith.constant 2 : i32
    %11 = arith.cmpi slt, %arg0, %c2_i32 : i32
    %12 = arith.extui %11 : i1 to i32
    %c0_i32_9 = arith.constant 0 : i32
    %13 = arith.cmpi ne, %12, %c0_i32_9 : i32
    scf.if %13 {
      %c128_i32 = arith.constant 128 : i32
      %14 = arith.muli %arg1, %c128_i32 : i32
      %15 = tpu.assume_multiple %14, 128 : i32
      %cst_10 = arith.constant 0.000000e+00 : f32
      %16 = vector.broadcast %cst_10 : f32 to vector<128x128xf32>
      %17 = arith.maximumf %9, %16 : vector<128x128xf32>
      %18 = arith.truncf %17 : vector<128x128xf32> to vector<128x128xbf16>
      %19 = arith.index_cast %15 : i32 to index
      %c0_11 = arith.constant 0 : index
      %20 = vector.load %arg7[%19, %c0_11] : memref<128x128xbf16, #tpu.memory_space<vmem>>, vector<128x128xbf16>
      tpu.vector_store %arg7[%19, %c0_11], %18 {strides = array<i32>} : memref<128x128xbf16, #tpu.memory_space<vmem>>, vector<128x128xbf16>,
    } else {
    }
    return
  }
  func.func @transform_0(%arg0: i32, %arg1: i32) -> (i32, i32) {
    %c0_i32 = arith.constant 0 : i32
    %c0_i32_0 = arith.constant 0 : i32
    return %arg1, %c0_i32 : i32, i32
  }
  func.func @transform_1(%arg0: i32, %arg1: i32) -> (i32, i32) {
    %c0_i32 = arith.constant 0 : i32
    %c0_i32_0 = arith.constant 0 : i32
    %c0_i32_1 = arith.constant 0 : i32
    return %c0_i32, %c0_i32_0 : i32, i32
  }
  func.func @transform_2(%arg0: i32, %arg1: i32) -> (i32, i32, i32) {
    %c0_i32 = arith.constant 0 : i32
    %c0_i32_0 = arith.constant 0 : i32
    %c0_i32_1 = arith.constant 0 : i32
    return %arg0, %c0_i32, %c0_i32_0 : i32, i32, i32
  }
  func.func @transform_3(%arg0: i32, %arg1: i32) -> (i32, i32, i32) {
    %c0_i32 = arith.constant 0 : i32
    %c0_i32_0 = arith.constant 0 : i32
    %c0_i32_1 = arith.constant 0 : i32
    return %arg0, %c0_i32, %c0_i32_0 : i32, i32, i32
  }
  func.func @transform_4(%arg0: i32, %arg1: i32) -> (i32, i32) {
    %c0_i32 = arith.constant 0 : i32
    %c0_i32_0 = arith.constant 0 : i32
    return %arg1, %c0_i32 : i32, i32
  }
}

</mosaic_0001>

<bundles_post_ra>
// kernel: encoder_forward.1
= control target key start
LH: loop header
LB: loop body
LE: loop exit
PB: predicated region body
PF: predicated region fallthrough
CT: control target
= control target key end

     0   :  { %s1925_s15 = smov 0   ;;  %s1927_s16 = smov 0   ;;  %s2092_s0 = inlined_call_operand.vmem [shape: bf16[128,128], index: 0, kind: input, shape index: {}]   ;;  %s2093_s1 = inlined_call_operand.vmem [shape: bf16[128,128], index: 1, kind: input, shape index: {}]   ;;  %s2094_s2 = inlined_call_operand.vmem [shape: bf16[3,128,128], index: 2, kind: input, shape index: {}]   ;;  %s2095_s3 = inlined_call_operand.vmem [shape: f32[3,1,128], index: 3, kind: input, shape index: {}]   ;;  %s2096_s4 = inlined_call_operand.vmem [shape: f32[128,128], index: 4, kind: output, shape index: {}]  }
   0x1   :  { %s1929_s17 = smov 0  }
   0x2 LB: > { %s26_s18 = sadd.s32 1, %s1894_s16  ;;  %p1315_p0 = scmp.ge.s32.totalorder %s1898_s17, 1  ;;  %s1898_s17 = sphi %s1929_s17, %s14_s17   ;;  %s1894_s16 = sphi %s1927_s16, %s2098_s16   ;;  %s1890_s15 = sphi %s1925_s15, %s2097_s15  }
   0x3   : > { %p28_p1 = scmp.ge.s32.totalorder %s26_s18, 3  ;;  %p193_p2 = scmp.lt.s32.totalorder %s1898_s17, 4 }
   0x5   : > { %s2100_s18 = smov (%p28_p1, %s26_s18), 0  ;;  %p194_p3 = pnand %p1315_p0, %p193_p2 }
   0x6   : > { %p233_p4 = scmp.lt.s32.totalorder (!%p194_p3), %s1890_s15, 2  ;;  %p1318_p5 = scmp.ne.s32.totalorder (!%p194_p3), %s1890_s15, 0 }
   0x7   : > { %197 = sbr.rel (%p194_p3) target bundleno = 768 (0x300), region = 36 }
   0xc   : > { %s1947_s19 = scalar_select %p233_p4, %s1890_s15, 2 }
   0xd   : > { %255 = sbr.rel (%p1318_p5) target bundleno = 261 (0x105), region = 44 }
   0xe   : > { %s1422_s20 = sshll.u32 %s1947_s19, 6  ;;  %s240_s23 = scalar_lea.vmem %s2095_s3, %s1947_s19 }
   0xf   : > { %s1957_s26 = scalar_lea.vmem %s2094_s2, %s1422_s20 }
  0x12   : > { %v1828_v0 = vld [vmem:[%s1957_s26 + $0x38] sm:$0xff]   ;;  %v1829_v1 = vld [vmem:[%s1957_s26 + $0x30] sm:$0xff]   ;;  %v1830_v2 = vld [vmem:[%s1957_s26 + $0x28] sm:$0xff]  }
  0x13   : > { %1660 = vmatprep.subr.bf16.mxu0 %v1828_v0  ;;  %1756 = vmatprep.subr.bf16.mxu1 %v1828_v0  ;;  %v1831_v3 = vld [vmem:[%s1957_s26 + $0x20] sm:$0xff]   ;;  %v1832_v6 = vld [vmem:[%s1957_s26 + $0x18] sm:$0xff]   ;;  %v1833_v7 = vld [vmem:[%s1957_s26 + $0x10] sm:$0xff]  }
  0x14   : > { %1661 = vmatpush3.bf16.msra.mxu0 %v1828_v0  ;;  %1764 = vmatpush3.bf16.msra.mxu1 %v1828_v0  ;;  %v1836_v4 = vld [vmem:[%s2093_s1] sm:$0xff]   ;;  %v1834_v8 = vld [vmem:[%s1957_s26 + $0x8] sm:$0xff]   ;;  %v1840_v12 = vld [vmem:[%s2093_s1 + $0x10] sm:$0xff]  }
  0x15   : > { %1662 = vmatprep.subr.bf16.mxu0 %v1829_v1  ;;  %1757 = vmatprep.subr.bf16.mxu1 %v1829_v1  ;;  %v1837_v5 = vld [vmem:[%s2093_s1 + $0x20] sm:$0xff]   ;;  %v1838_v10 = vld [vmem:[%s2093_s1 + $0x8] sm:$0xff]   ;;  %v1841_v13 = vld [vmem:[%s2093_s1 + $0x30] sm:$0xff]  }
  0x16   : > { %1676 = vmatprep.mubr.bf16.mxu0 %v1836_v4  ;;  %1684 = vmatprep.mubr.bf16.mxu1 %v1837_v5  ;;  %v1835_v9 = vld [vmem:[%s1957_s26] sm:$0xff]   ;;  %v1839_v11 = vld [vmem:[%s2093_s1 + $0x28] sm:$0xff]   ;;  %v1842_v14 = vld [vmem:[%s2093_s1 + $0x18] sm:$0xff]  }
  0x17   : > { %v1843_v15 = vld [vmem:[%s2093_s1 + $0x38] sm:$0xff]  }
  0x18   : > { %1663 = vmatpush3.bf16.msra.mxu0 %v1829_v1  ;;  %1765 = vmatpush3.bf16.msra.mxu1 %v1829_v1 }
  0x19   : > { %1664 = vmatprep.subr.bf16.mxu0 %v1830_v2  ;;  %1758 = vmatprep.subr.bf16.mxu1 %v1830_v2 }
  0x1c   : > { %1665 = vmatpush3.bf16.msra.mxu0 %v1830_v2  ;;  %1766 = vmatpush3.bf16.msra.mxu1 %v1830_v2 }
  0x1d   : > { %1666 = vmatprep.subr.bf16.mxu0 %v1831_v3  ;;  %1759 = vmatprep.subr.bf16.mxu1 %v1831_v3 }
  0x20   : > { %1667 = vmatpush3.bf16.msra.mxu0 %v1831_v3  ;;  %1767 = vmatpush3.bf16.msra.mxu1 %v1831_v3 }
  0x21   : > { %1668 = vmatprep.subr.bf16.mxu0 %v1832_v6  ;;  %1760 = vmatprep.subr.bf16.mxu1 %v1832_v6 }
  0x24   : > { %1669 = vmatpush3.bf16.msra.mxu0 %v1832_v6  ;;  %1768 = vmatpush3.bf16.msra.mxu1 %v1832_v6 }
  0x25   : > { %1670 = vmatprep.subr.bf16.mxu0 %v1833_v7  ;;  %1761 = vmatprep.subr.bf16.mxu1 %v1833_v7 }
  0x28   : > { %1671 = vmatpush3.bf16.msra.mxu0 %v1833_v7  ;;  %1769 = vmatpush3.bf16.msra.mxu1 %v1833_v7 }
  0x29   : > { %1672 = vmatprep.subr.bf16.mxu0 %v1834_v8  ;;  %1762 = vmatprep.subr.bf16.mxu1 %v1834_v8 }
  0x2c   : > { %1673 = vmatpush3.bf16.msra.mxu0 %v1834_v8  ;;  %1770 = vmatpush3.bf16.msra.mxu1 %v1834_v8 }
  0x2d   : > { %1674 = vmatprep.subr.bf16.mxu0 %v1835_v9  ;;  %1763 = vmatprep.subr.bf16.mxu1 %v1835_v9 }
  0x30   : > { %1675 = vmatpush3.bf16.msra.mxu0 %v1835_v9  ;;  %1771 = vmatpush3.bf16.msra.mxu1 %v1835_v9 }
  0x33   : > { %1677 = vmatmul.mubr.bf16.vlgmr.msra.gmra.mxu0 %v1838_v10  ;;  %1685 = vmatmul.mubr.bf16.vlgmr.msra.gmra.mxu1 %v1839_v11 }
  0x34   : > { %1680 = vmatprep.mubr.bf16.mxu0 %v1840_v12  ;;  %1688 = vmatprep.mubr.bf16.mxu1 %v1841_v13 }
  0x3b   : > { %1681 = vmatmul.mubr.bf16.gmra.mxu0 %v1842_v14  ;;  %1689 = vmatmul.mubr.bf16.gmra.mxu1 %v1843_v15 }
  0xf3   : > { %v1678_v16 = vpop.f32.mrf.mxu0  ;;  %v1686_v17 = vpop.f32.mrf.mxu1 }
  0xf5   : > { %v418_v18 = vpop.f32.mrf.mxu0  ;;  %v450_v19 = vpop.f32.mrf.mxu1 }
  0xf7   : > { %v1679_v20 = vpop.f32.mrf.mxu0  ;;  %v1687_v21 = vpop.f32.mrf.mxu1 }
  0xf8   : > { %v1479_v22 = vpack.c.bf16 %v1679_v20, %v1678_v16  ;;  %v1499_v23 = vpack.c.bf16 %v1687_v21, %v1686_v17 }
  0xf9   : > { %v421_v24 = vpop.f32.mrf.mxu0  ;;  %v453_v25 = vpop.f32.mrf.mxu1 }
  0xfa   : > { %1591 = vst [vmem:[#allocation3 + $0x8] sm:$0xff] %v1479_v22   ;;  %1595 = vst [vmem:[#allocation3 + $0x28] sm:$0xff] %v1499_v23   ;;  %v1474_v26 = vpack.c.bf16 %v421_v24, %v418_v18  ;;  %v1494_v27 = vpack.c.bf16 %v453_v25, %v450_v19 }
  0xfb   : > { %v1682_v28 = vpop.f32.mrf.mxu0  ;;  %v1690_v29 = vpop.f32.mrf.mxu1 }
  0xfc   : > { %1475 = vst [vmem:[#allocation3] sm:$0xff] %v1474_v26   ;;  %1594 = vst [vmem:[#allocation3 + $0x20] sm:$0xff] %v1494_v27  }
  0xfd   : > { %v434_v30 = vpop.f32.mrf.mxu0  ;;  %v466_v31 = vpop.f32.mrf.mxu1 }
  0xff   : > { %v1683_v32 = vpop.f32.mrf.mxu0  ;;  %v1691_v33 = vpop.f32.mrf.mxu1 }
 0x100   : > { %v1489_v34 = vpack.c.bf16 %v1683_v32, %v1682_v28  ;;  %v1509_v35 = vpack.c.bf16 %v1691_v33, %v1690_v29 }
 0x101   : > { %v437_v36 = vpop.f32.mrf.mxu0  ;;  %v469_v37 = vpop.f32.mrf.mxu1 }
 0x102   : > { %1593 = vst [vmem:[#allocation3 + $0x18] sm:$0xff] %v1489_v34   ;;  %1597 = vst [vmem:[#allocation3 + $0x38] sm:$0xff] %v1509_v35   ;;  %v1484_v38 = vpack.c.bf16 %v437_v36, %v434_v30  ;;  %v1504_v39 = vpack.c.bf16 %v469_v37, %v466_v31 }
 0x104   : > { %1592 = vst [vmem:[#allocation3 + $0x10] sm:$0xff] %v1484_v38   ;;  %1596 = vst [vmem:[#allocation3 + $0x30] sm:$0xff] %v1504_v39  }
 0x105 PF: > { %p1351_p6 = scmp.le.s32.totalorder %s1890_s15, 0 }
 0x107   : > { %564 = sbr.rel (%p1351_p6) target bundleno = 511 (0x1ff), region = 48 }
 0x10c   : > { %v1844_v40 = vld [vmem:[%s1957_s26 + $0x38] sm:$0xff]   ;;  %v1845_v41 = vld [vmem:[%s1957_s26 + $0x30] sm:$0xff]   ;;  %v1846_v42 = vld [vmem:[%s1957_s26 + $0x28] sm:$0xff]  }
 0x10d   : > { %1692 = vmatprep.subr.bf16.mxu0 %v1844_v40  ;;  %1772 = vmatprep.subr.bf16.mxu1 %v1844_v40  ;;  %v1847_v43 = vld [vmem:[%s1957_s26 + $0x20] sm:$0xff]   ;;  %v1848_v46 = vld [vmem:[%s1957_s26 + $0x18] sm:$0xff]   ;;  %v1849_v47 = vld [vmem:[%s1957_s26 + $0x10] sm:$0xff]  }
 0x10e   : > { %1693 = vmatpush3.bf16.msra.mxu0 %v1844_v40  ;;  %1780 = vmatpush3.bf16.msra.mxu1 %v1844_v40  ;;  %v1852_v44 = vld [vmem:[#allocation2] sm:$0xff]   ;;  %v1850_v48 = vld [vmem:[%s1957_s26 + $0x8] sm:$0xff]   ;;  %v1856_v52 = vld [vmem:[#allocation2 + $0x10] sm:$0xff]  }
 0x10f   : > { %1694 = vmatprep.subr.bf16.mxu0 %v1845_v41  ;;  %1773 = vmatprep.subr.bf16.mxu1 %v1845_v41  ;;  %v1853_v45 = vld [vmem:[#allocation2 + $0x20] sm:$0xff]   ;;  %v1854_v50 = vld [vmem:[#allocation2 + $0x8] sm:$0xff]   ;;  %v1857_v53 = vld [vmem:[#allocation2 + $0x30] sm:$0xff]  }
 0x110   : > { %1708 = vmatprep.mubr.bf16.mxu0 %v1852_v44  ;;  %1716 = vmatprep.mubr.bf16.mxu1 %v1853_v45  ;;  %v1851_v49 = vld [vmem:[%s1957_s26] sm:$0xff]   ;;  %v1855_v51 = vld [vmem:[#allocation2 + $0x28] sm:$0xff]   ;;  %v1858_v54 = vld [vmem:[#allocation2 + $0x18] sm:$0xff]  }
 0x111   : > { %v1859_v55 = vld [vmem:[#allocation2 + $0x38] sm:$0xff]  }
 0x112   : > { %1695 = vmatpush3.bf16.msra.mxu0 %v1845_v41  ;;  %1781 = vmatpush3.bf16.msra.mxu1 %v1845_v41 }
 0x113   : > { %1696 = vmatprep.subr.bf16.mxu0 %v1846_v42  ;;  %1774 = vmatprep.subr.bf16.mxu1 %v1846_v42 }
 0x116   : > { %1697 = vmatpush3.bf16.msra.mxu0 %v1846_v42  ;;  %1782 = vmatpush3.bf16.msra.mxu1 %v1846_v42 }
 0x117   : > { %1698 = vmatprep.subr.bf16.mxu0 %v1847_v43  ;;  %1775 = vmatprep.subr.bf16.mxu1 %v1847_v43 }
 0x11a   : > { %1699 = vmatpush3.bf16.msra.mxu0 %v1847_v43  ;;  %1783 = vmatpush3.bf16.msra.mxu1 %v1847_v43 }
 0x11b   : > { %1700 = vmatprep.subr.bf16.mxu0 %v1848_v46  ;;  %1776 = vmatprep.subr.bf16.mxu1 %v1848_v46 }
 0x11e   : > { %1701 = vmatpush3.bf16.msra.mxu0 %v1848_v46  ;;  %1784 = vmatpush3.bf16.msra.mxu1 %v1848_v46 }
 0x11f   : > { %1702 = vmatprep.subr.bf16.mxu0 %v1849_v47  ;;  %1777 = vmatprep.subr.bf16.mxu1 %v1849_v47 }
 0x122   : > { %1703 = vmatpush3.bf16.msra.mxu0 %v1849_v47  ;;  %1785 = vmatpush3.bf16.msra.mxu1 %v1849_v47 }
 0x123   : > { %1704 = vmatprep.subr.bf16.mxu0 %v1850_v48  ;;  %1778 = vmatprep.subr.bf16.mxu1 %v1850_v48 }
 0x126   : > { %1705 = vmatpush3.bf16.msra.mxu0 %v1850_v48  ;;  %1786 = vmatpush3.bf16.msra.mxu1 %v1850_v48 }
 0x127   : > { %1706 = vmatprep.subr.bf16.mxu0 %v1851_v49  ;;  %1779 = vmatprep.subr.bf16.mxu1 %v1851_v49 }
 0x12a   : > { %1707 = vmatpush3.bf16.msra.mxu0 %v1851_v49  ;;  %1787 = vmatpush3.bf16.msra.mxu1 %v1851_v49 }
 0x12d   : > { %1709 = vmatmul.mubr.bf16.vlgmr.msra.gmra.mxu0 %v1854_v50  ;;  %1717 = vmatmul.mubr.bf16.vlgmr.msra.gmra.mxu1 %v1855_v51 }
 0x12e   : > { %1712 = vmatprep.mubr.bf16.mxu0 %v1856_v52  ;;  %1720 = vmatprep.mubr.bf16.mxu1 %v1857_v53 }
 0x135   : > { %1713 = vmatmul.mubr.bf16.gmra.mxu0 %v1858_v54  ;;  %1721 = vmatmul.mubr.bf16.gmra.mxu1 %v1859_v55 }
 0x1ed   : > { %v1710_v56 = vpop.f32.mrf.mxu0  ;;  %v1718_v57 = vpop.f32.mrf.mxu1 }
 0x1ef   : > { %v727_v58 = vpop.f32.mrf.mxu0  ;;  %v759_v59 = vpop.f32.mrf.mxu1 }
 0x1f1   : > { %v1711_v60 = vpop.f32.mrf.mxu0  ;;  %v1719_v61 = vpop.f32.mrf.mxu1 }
 0x1f2   : > { %v1519_v62 = vpack.c.bf16 %v1711_v60, %v1710_v56  ;;  %v1539_v63 = vpack.c.bf16 %v1719_v61, %v1718_v57 }
 0x1f3   : > { %v730_v0 = vpop.f32.mrf.mxu0  ;;  %v762_v1 = vpop.f32.mrf.mxu1 }
 0x1f4   : > { %1598 = vst [vmem:[#allocation3 + $0x8] sm:$0xff] %v1519_v62   ;;  %1602 = vst [vmem:[#allocation3 + $0x28] sm:$0xff] %v1539_v63   ;;  %v1514_v2 = vpack.c.bf16 %v730_v0, %v727_v58  ;;  %v1534_v3 = vpack.c.bf16 %v762_v1, %v759_v59 }
 0x1f5   : > { %v1714_v4 = vpop.f32.mrf.mxu0  ;;  %v1722_v5 = vpop.f32.mrf.mxu1 }
 0x1f6   : > { %1515 = vst [vmem:[#allocation3] sm:$0xff] %v1514_v2   ;;  %1601 = vst [vmem:[#allocation3 + $0x20] sm:$0xff] %v1534_v3  }
 0x1f7   : > { %v743_v6 = vpop.f32.mrf.mxu0  ;;  %v775_v7 = vpop.f32.mrf.mxu1 }
 0x1f9   : > { %v1715_v8 = vpop.f32.mrf.mxu0  ;;  %v1723_v9 = vpop.f32.mrf.mxu1 }
 0x1fa   : > { %v1529_v10 = vpack.c.bf16 %v1715_v8, %v1714_v4  ;;  %v1549_v11 = vpack.c.bf16 %v1723_v9, %v1722_v5 }
 0x1fb   : > { %v746_v12 = vpop.f32.mrf.mxu0  ;;  %v778_v13 = vpop.f32.mrf.mxu1 }
 0x1fc   : > { %1600 = vst [vmem:[#allocation3 + $0x18] sm:$0xff] %v1529_v10   ;;  %1604 = vst [vmem:[#allocation3 + $0x38] sm:$0xff] %v1549_v11   ;;  %v1524_v14 = vpack.c.bf16 %v746_v12, %v743_v6  ;;  %v1544_v15 = vpack.c.bf16 %v778_v13, %v775_v7 }
 0x1fe   : > { %1599 = vst [vmem:[#allocation3 + $0x10] sm:$0xff] %v1524_v14   ;;  %1603 = vst [vmem:[#allocation3 + $0x30] sm:$0xff] %v1544_v15  }
 0x1ff PF: > { %v1862_v18 = vld [vmem:[#allocation3 + $0x28] sm:$0xff]   ;;  %v1863_v19 = vld [vmem:[#allocation3 + $0x20] sm:$0xff]   ;;  %v1872_v28 = vld [vmem:[%s2092_s0 + $0x10] sm:$0xff]   ;;  %p1401_p7 = scmp.ge.s32.totalorder %s1890_s15, 2 }
 0x200   : > { %v1868_v20 = vld [vmem:[%s2092_s0] sm:$0xff]   ;;  %v1866_v24 = vld [vmem:[#allocation3 + $0x8] sm:$0xff]   ;;  %v1873_v29 = vld [vmem:[%s2092_s0 + $0x30] sm:$0xff]  }
 0x201   : > { %v1869_v21 = vld [vmem:[%s2092_s0 + $0x20] sm:$0xff]   ;;  %1740 = vmatprep.mubr.bf16.mxu0 %v1868_v20  ;;  %v1870_v26 = vld [vmem:[%s2092_s0 + $0x8] sm:$0xff]   ;;  %v1874_v30 = vld [vmem:[%s2092_s0 + $0x18] sm:$0xff]  }
 0x202   : > { %1748 = vmatprep.mubr.bf16.mxu1 %v1869_v21  ;;  %v1867_v25 = vld [vmem:[#allocation3] sm:$0xff]   ;;  %v1871_v27 = vld [vmem:[%s2092_s0 + $0x28] sm:$0xff]   ;;  %v1875_v31 = vld [vmem:[%s2092_s0 + $0x38] sm:$0xff]  }
 0x203   : > { %v1860_v16 = vld [vmem:[#allocation3 + $0x38] sm:$0xff]   ;;  %v1384_v32 = vld [vmem:[%s240_s23] ss:$0 sm:$0xff] }
 0x204   : > { %1724 = vmatprep.subr.bf16.mxu0 %v1860_v16  ;;  %1788 = vmatprep.subr.bf16.mxu1 %v1860_v16  ;;  %v1864_v22 = vld [vmem:[#allocation3 + $0x18] sm:$0xff]  }
 0x205   : > { %v1861_v17 = vld [vmem:[#allocation3 + $0x30] sm:$0xff]   ;;  %1725 = vmatpush3.bf16.msra.mxu0 %v1860_v16  ;;  %1796 = vmatpush3.bf16.msra.mxu1 %v1860_v16 }
 0x206   : > { %1726 = vmatprep.subr.bf16.mxu0 %v1861_v17  ;;  %1789 = vmatprep.subr.bf16.mxu1 %v1861_v17  ;;  %v1865_v23 = vld [vmem:[#allocation3 + $0x10] sm:$0xff]  }
 0x209   : > { %1727 = vmatpush3.bf16.msra.mxu0 %v1861_v17  ;;  %1797 = vmatpush3.bf16.msra.mxu1 %v1861_v17 }
 0x20a   : > { %1728 = vmatprep.subr.bf16.mxu0 %v1862_v18  ;;  %1790 = vmatprep.subr.bf16.mxu1 %v1862_v18 }
 0x20d   : > { %1729 = vmatpush3.bf16.msra.mxu0 %v1862_v18  ;;  %1798 = vmatpush3.bf16.msra.mxu1 %v1862_v18 }
 0x20e   : > { %1730 = vmatprep.subr.bf16.mxu0 %v1863_v19  ;;  %1791 = vmatprep.subr.bf16.mxu1 %v1863_v19 }
 0x211   : > { %1731 = vmatpush3.bf16.msra.mxu0 %v1863_v19  ;;  %1799 = vmatpush3.bf16.msra.mxu1 %v1863_v19 }
 0x212   : > { %1732 = vmatprep.subr.bf16.mxu0 %v1864_v22  ;;  %1792 = vmatprep.subr.bf16.mxu1 %v1864_v22 }
 0x215   : > { %1733 = vmatpush3.bf16.msra.mxu0 %v1864_v22  ;;  %1800 = vmatpush3.bf16.msra.mxu1 %v1864_v22 }
 0x216   : > { %1734 = vmatprep.subr.bf16.mxu0 %v1865_v23  ;;  %1793 = vmatprep.subr.bf16.mxu1 %v1865_v23 }
 0x219   : > { %1735 = vmatpush3.bf16.msra.mxu0 %v1865_v23  ;;  %1801 = vmatpush3.bf16.msra.mxu1 %v1865_v23 }
 0x21a   : > { %1736 = vmatprep.subr.bf16.mxu0 %v1866_v24  ;;  %1794 = vmatprep.subr.bf16.mxu1 %v1866_v24 }
 0x21d   : > { %1737 = vmatpush3.bf16.msra.mxu0 %v1866_v24  ;;  %1802 = vmatpush3.bf16.msra.mxu1 %v1866_v24 }
 0x21e   : > { %1738 = vmatprep.subr.bf16.mxu0 %v1867_v25  ;;  %1795 = vmatprep.subr.bf16.mxu1 %v1867_v25 }
 0x221   : > { %1739 = vmatpush3.bf16.msra.mxu0 %v1867_v25  ;;  %1803 = vmatpush3.bf16.msra.mxu1 %v1867_v25 }
 0x224   : > { %1741 = vmatmul.mubr.bf16.vlgmr.msra.gmra.mxu0 %v1870_v26  ;;  %1749 = vmatmul.mubr.bf16.vlgmr.msra.gmra.mxu1 %v1871_v27 }
 0x225   : > { %1744 = vmatprep.mubr.bf16.mxu0 %v1872_v28  ;;  %1752 = vmatprep.mubr.bf16.mxu1 %v1873_v29 }
 0x22c   : > { %1745 = vmatmul.mubr.bf16.gmra.mxu0 %v1874_v30  ;;  %1753 = vmatmul.mubr.bf16.gmra.mxu1 %v1875_v31 }
 0x2e4   : > { %v1742_v33 = vpop.f32.mrf.mxu0  ;;  %v1750_v34 = vpop.f32.mrf.mxu1 }
 0x2e5   : > { %v1048_v35 = vadd.f32 %v1742_v33, %v1384_v32  ;;  %v2030_v36 = vadd.f32 %v1750_v34, %v1384_v32 }
 0x2e6   : > { %v1039_v37 = vpop.f32.mrf.mxu0  ;;  %v1071_v38 = vpop.f32.mrf.mxu1 }
 0x2e7   : > { %1104 = vst [vmem:[%s2096_s4 + $0x10] sm:$0xff] %v1048_v35  ;;  %1112 = vst [vmem:[%s2096_s4 + $0x50] sm:$0xff] %v2030_v36  ;;  %v1040_v39 = vadd.f32 %v1384_v32, %v1039_v37  ;;  %v1072_v40 = vadd.f32 %v1384_v32, %v1071_v38 }
 0x2e8   : > { %v1743_v41 = vpop.f32.mrf.mxu0  ;;  %v1751_v42 = vpop.f32.mrf.mxu1 }
 0x2e9   : > { %1102 = vst [vmem:[%s2096_s4] sm:$0xff] %v1040_v39  ;;  %1110 = vst [vmem:[%s2096_s4 + $0x40] sm:$0xff] %v1072_v40  ;;  %v1051_v43 = vadd.f32 %v1743_v41, %v1384_v32  ;;  %v1083_v44 = vadd.f32 %v1751_v42, %v1384_v32 }
 0x2ea   : > { %v1042_v45 = vpop.f32.mrf.mxu0  ;;  %v1074_v46 = vpop.f32.mrf.mxu1 }
 0x2eb   : > { %1105 = vst [vmem:[%s2096_s4 + $0x18] sm:$0xff] %v1051_v43  ;;  %1113 = vst [vmem:[%s2096_s4 + $0x58] sm:$0xff] %v1083_v44  ;;  %v1043_v47 = vadd.f32 %v1384_v32, %v1042_v45  ;;  %v1075_v48 = vadd.f32 %v1384_v32, %v1074_v46 }
 0x2ec   : > { %v1746_v49 = vpop.f32.mrf.mxu0  ;;  %v1754_v50 = vpop.f32.mrf.mxu1 }
 0x2ed   : > { %1103 = vst [vmem:[%s2096_s4 + $0x8] sm:$0xff] %v1043_v47  ;;  %1111 = vst [vmem:[%s2096_s4 + $0x48] sm:$0xff] %v1075_v48  ;;  %v1064_v51 = vadd.f32 %v1746_v49, %v1384_v32  ;;  %v1096_v52 = vadd.f32 %v1754_v50, %v1384_v32 }
 0x2ee   : > { %v1055_v53 = vpop.f32.mrf.mxu0  ;;  %v1087_v54 = vpop.f32.mrf.mxu1 }
 0x2ef   : > { %1108 = vst [vmem:[%s2096_s4 + $0x30] sm:$0xff] %v1064_v51  ;;  %1116 = vst [vmem:[%s2096_s4 + $0x70] sm:$0xff] %v1096_v52  ;;  %v1056_v55 = vadd.f32 %v1384_v32, %v1055_v53  ;;  %v1088_v56 = vadd.f32 %v1384_v32, %v1087_v54 }
 0x2f0   : > { %v1747_v57 = vpop.f32.mrf.mxu0  ;;  %v1755_v58 = vpop.f32.mrf.mxu1 }
 0x2f1   : > { %1106 = vst [vmem:[%s2096_s4 + $0x20] sm:$0xff] %v1056_v55  ;;  %1114 = vst [vmem:[%s2096_s4 + $0x60] sm:$0xff] %v1088_v56  ;;  %v1067_v59 = vadd.f32 %v1747_v57, %v1384_v32  ;;  %v1099_v60 = vadd.f32 %v1755_v58, %v1384_v32  ;;  %1121 = sbr.rel (%p1401_p7) target bundleno = 768 (0x300), region = 52 }
 0x2f2   : > { %v1058_v61 = vpop.f32.mrf.mxu0  ;;  %v1090_v62 = vpop.f32.mrf.mxu1 }
 0x2f3   : > { %1109 = vst [vmem:[%s2096_s4 + $0x38] sm:$0xff] %v1067_v59  ;;  %1117 = vst [vmem:[%s2096_s4 + $0x78] sm:$0xff] %v1099_v60  ;;  %v1059_v63 = vadd.f32 %v1384_v32, %v1058_v61  ;;  %v1091_v0 = vadd.f32 %v1384_v32, %v1090_v62 }
 0x2f5   : > { %1107 = vst [vmem:[%s2096_s4 + $0x28] sm:$0xff] %v1059_v63  ;;  %1115 = vst [vmem:[%s2096_s4 + $0x68] sm:$0xff] %v1091_v0 }
 0x2f6   : > { %v1123_v1 = vmax.f32 %v1040_v39, 0.0  ;;  %v1124_v2 = vmax.f32 %v1043_v47, 0.0  ;;  %v1125_v3 = vmax.f32 %v1048_v35, 0.0  ;;  %v1126_v4 = vmax.f32 %v1051_v43, 0.0 }
 0x2f7   : > { %v1127_v5 = vmax.f32 %v1056_v55, 0.0  ;;  %v1128_v6 = vmax.f32 %v1059_v63, 0.0  ;;  %v1129_v7 = vmax.f32 %v1064_v51, 0.0  ;;  %v1130_v8 = vmax.f32 %v1067_v59, 0.0 }
 0x2f8   : > { %v1554_v9 = vpack.c.bf16 %v1124_v2, %v1123_v1  ;;  %v1559_v10 = vpack.c.bf16 %v1126_v4, %v1125_v3  ;;  %v1131_v11 = vmax.f32 %v1072_v40, 0.0  ;;  %v1132_v12 = vmax.f32 %v1075_v48, 0.0 }
 0x2f9   : > { %v1564_v13 = vpack.c.bf16 %v1128_v6, %v1127_v5  ;;  %v1569_v14 = vpack.c.bf16 %v1130_v8, %v1129_v7  ;;  %v1133_v15 = vmax.f32 %v2030_v36, 0.0  ;;  %v1134_v16 = vmax.f32 %v1083_v44, 0.0 }
 0x2fa   : > { %1555 = vst [vmem:[#allocation2] sm:$0xff] %v1554_v9   ;;  %1605 = vst [vmem:[#allocation2 + $0x8] sm:$0xff] %v1559_v10   ;;  %v1574_v17 = vpack.c.bf16 %v1132_v12, %v1131_v11  ;;  %v1135_v18 = vmax.f32 %v1088_v56, 0.0  ;;  %v1136_v19 = vmax.f32 %v1091_v0, 0.0  ;;  %v1137_v20 = vmax.f32 %v1096_v52, 0.0 }
 0x2fb   : > { %1606 = vst [vmem:[#allocation2 + $0x10] sm:$0xff] %v1564_v13   ;;  %1607 = vst [vmem:[#allocation2 + $0x18] sm:$0xff] %v1569_v14   ;;  %v1579_v21 = vpack.c.bf16 %v1134_v16, %v1133_v15  ;;  %v1138_v22 = vmax.f32 %v1099_v60, 0.0 }
 0x2fc   : > { %1608 = vst [vmem:[#allocation2 + $0x20] sm:$0xff] %v1574_v17   ;;  %v1584_v23 = vpack.c.bf16 %v1136_v19, %v1135_v18 }
 0x2fd   : > { %1609 = vst [vmem:[#allocation2 + $0x28] sm:$0xff] %v1579_v21   ;;  %v1589_v24 = vpack.c.bf16 %v1138_v22, %v1137_v20 }
 0x2fe   : > { %1610 = vst [vmem:[#allocation2 + $0x30] sm:$0xff] %v1584_v23  }
 0x2ff   : > { %1611 = vst [vmem:[#allocation2 + $0x38] sm:$0xff] %v1589_v24  }
 0x300 PF: > { %s14_s17 = sadd.s32 1, %s1898_s17   ;;  %s2097_s15 = smov %s1894_s16 }
 0x301   : > { %p11_p8 = scmp.ge.s32.totalorder %s14_s17, 5   ;;  %s2098_s16 = smov %s2100_s18 }
 0x303   :  { %13 = sbr.rel (!%p11_p8) target bundleno = 2 (0x2), region = 89 }

</bundles_post_ra>
